<compile_context>
chip_gen: v6e
topology: v6e:2x2x1
jax: 0.10.0
libtpu: 0.0.40
codegen_flags: <defaults>
</compile_context>

<pallas_src>
import jax
import jax.numpy as jnp
from jax.experimental import pallas as pl
from jax.experimental.pallas import tpu as pltpu


_TB_MAX = 1024  # batch-tile rows; buffers stay at a few hundred KiB


def _round_up(x, m):
    return pl.cdiv(x, m) * m


def _edge_mlp_kernel(e1_ref, e2_ref, t_ref, w1a_ref, w1b_ref, w1t_ref,
                     b1_ref, w2_ref, b2_ref, o_ref):
    # First layer: fused-concat matmul as three partial products
    # (bf16 inputs, f32 accumulation on the MXU), bias + ReLU in f32.
    h = jnp.dot(e1_ref[...], w1a_ref[...], preferred_element_type=jnp.float32)
    h += jnp.dot(e2_ref[...], w1b_ref[...], preferred_element_type=jnp.float32)
    h += jnp.dot(t_ref[...], w1t_ref[...], preferred_element_type=jnp.float32)
    h = jnp.maximum(h + b1_ref[...], 0.0)
    # Second layer (hidden -> 1): VPU multiply + lane reduction (MXU stays free).
    z = jnp.sum(h * w2_ref[...], axis=-1, keepdims=True) + b2_ref[...]
    o_ref[...] = jax.nn.sigmoid(z).astype(o_ref.dtype)


def edge_classifier_with_text(e1, e2, t, params):
    """Forward pass of EdgeClassifierWithText. Returns [B, 1] probabilities (f32)."""
    w1, b1, w2, b2 = params["w1"], params["b1"], params["w2"], params["b2"]
    B, E = e1.shape
    T = t.shape[1]
    H = w1.shape[1]

    # Trace-time split of W1 (fuses the concat into partial matmuls); bf16 loads.
    w1a = w1[:E, :].astype(jnp.bfloat16)
    w1b = w1[E:2 * E, :].astype(jnp.bfloat16)
    w1t = w1[2 * E:, :].astype(jnp.bfloat16)
    b1r = b1.reshape(1, H).astype(jnp.float32)
    w2r = w2.reshape(1, H).astype(jnp.float32)
    b2r = b2.reshape(1, 1).astype(jnp.float32)

    e1_b = e1.astype(jnp.bfloat16)
    e2_b = e2.astype(jnp.bfloat16)
    t_b = t.astype(jnp.bfloat16)

    # Batch tile: big enough to amortize per-step overhead, 128-row aligned.
    TB = min(_TB_MAX, _round_up(B, 128))
    B_pad = _round_up(B, TB)
    if B_pad != B:
        pad = ((0, B_pad - B), (0, 0))
        e1_b = jnp.pad(e1_b, pad)
        e2_b = jnp.pad(e2_b, pad)
        t_b = jnp.pad(t_b, pad)

    out = pl.pallas_call(
        _edge_mlp_kernel,
        out_shape=jax.ShapeDtypeStruct((B_pad, 1), jnp.float32),
        grid=(B_pad // TB,),
        in_specs=[
            # activations: tiled along the batch axis
            pl.BlockSpec((TB, E), lambda i: (i, 0)),
            pl.BlockSpec((TB, E), lambda i: (i, 0)),
            pl.BlockSpec((TB, T), lambda i: (i, 0)),
            # weights / biases: constant block index -> stay resident in VMEM
            pl.BlockSpec((E, H), lambda i: (0, 0)),
            pl.BlockSpec((E, H), lambda i: (0, 0)),
            pl.BlockSpec((T, H), lambda i: (0, 0)),
            pl.BlockSpec((1, H), lambda i: (0, 0)),
            pl.BlockSpec((1, H), lambda i: (0, 0)),
            pl.BlockSpec((1, 1), lambda i: (0, 0)),
        ],
        out_specs=pl.BlockSpec((TB, 1), lambda i: (i, 0)),
        compiler_params=pltpu.CompilerParams(
            dimension_semantics=("parallel",),
            vmem_limit_bytes=32 * 1024 * 1024,
        ),
    )(e1_b, e2_b, t_b, w1a, w1b, w1t, b1r, w2r, b2r)

    return out[:B]


def init_params(key, emb_dim, txt_dim, hidden=64):
    """Deterministic init mimicking torch.nn.Linear (uniform ±1/sqrt(fan_in))."""
    d_in = 2 * emb_dim + txt_dim
    k1, k2, k3, k4 = jax.random.split(key, 4)
    bound1 = 1.0 / jnp.sqrt(d_in)
    bound2 = 1.0 / jnp.sqrt(hidden)
    return {
        # stored already transposed to [in, out] so the kernel does x @ W
        "w1": jax.random.uniform(k1, (d_in, hidden), jnp.float32, -bound1, bound1),
        "b1": jax.random.uniform(k2, (hidden,), jnp.float32, -bound1, bound1),
        "w2": jax.random.uniform(k3, (hidden,), jnp.float32, -bound2, bound2),
        "b2": jax.random.uniform(k4, (1,), jnp.float32, -bound2, bound2),
    }


def _reference(e1, e2, t, params):
    # Same bf16 quantization of the activation/W1 stream as the kernel,
    # f32 math otherwise.
    q = lambda a: a.astype(jnp.bfloat16).astype(jnp.float32)
    x = jnp.concatenate([q(e1), q(e2), q(t)], axis=1)
    w1 = q(params["w1"])
    h = jnp.maximum(x @ w1 + params["b1"].reshape(1, -1), 0.0)
    z = h @ params["w2"].reshape(-1, 1) + params["b2"].reshape(1, 1)
    return jax.nn.sigmoid(z)


if __name__ == "__main__":
    emb_dim, txt_dim, hidden, batch = 16, 32, 64, 8

    key = jax.random.PRNGKey(0)
    kp, ke1, ke2, kt = jax.random.split(key, 4)

    params = init_params(kp, emb_dim, txt_dim, hidden)
    e1 = jax.random.normal(ke1, (batch, emb_dim), jnp.float32)
    e2 = jax.random.normal(ke2, (batch, emb_dim), jnp.float32)
    t = jax.random.normal(kt, (batch, txt_dim), jnp.float32)

    out = edge_classifier_with_text(e1, e2, t, params)
    jax.block_until_ready(out)

    ref = _reference(e1, e2, t, params)
    assert out.shape == (batch, 1), out.shape
    err = jnp.max(jnp.abs(out - ref))
    assert jnp.allclose(out, ref, atol=1e-4, rtol=1e-4), f"mismatch, max err {err}"

    print("KERNEL_OK")
</pallas_src>

<mosaic_0001>
module attributes {stable_mosaic.version = 11 : i64} {
  func.func @_edge_mlp_kernel(%arg0: i32, %arg1: memref<128x16xbf16, #tpu.memory_space<vmem>>, %arg2: memref<128x16xbf16, #tpu.memory_space<vmem>>, %arg3: memref<128x32xbf16, #tpu.memory_space<vmem>>, %arg4: memref<16x64xbf16, #tpu.memory_space<vmem>>, %arg5: memref<16x64xbf16, #tpu.memory_space<vmem>>, %arg6: memref<32x64xbf16, #tpu.memory_space<vmem>>, %arg7: memref<1x64xf32, #tpu.memory_space<vmem>>, %arg8: memref<1x64xf32, #tpu.memory_space<vmem>>, %arg9: memref<1x1xf32, #tpu.memory_space<vmem>>, %arg10: memref<128x1xf32, #tpu.memory_space<vmem>>) attributes {dimension_semantics = [#tpu.dimension_semantics<parallel>], iteration_bounds = array<i64: 1>, scalar_prefetch = 0 : i64, scratch_operands = 0 : i64, tpu.core_type = #tpu.core_type<tc>, window_params = [{transform_indices = @transform_0, window_bounds = array<i64: 128, 16>}, {transform_indices = @transform_1, window_bounds = array<i64: 128, 16>}, {transform_indices = @transform_2, window_bounds = array<i64: 128, 32>}, {pipeline_mode = #tpu.pipeline_mode<synchronous>, transform_indices = @transform_3, window_bounds = array<i64: 16, 64>}, {pipeline_mode = #tpu.pipeline_mode<synchronous>, transform_indices = @transform_4, window_bounds = array<i64: 16, 64>}, {pipeline_mode = #tpu.pipeline_mode<synchronous>, transform_indices = @transform_5, window_bounds = array<i64: 32, 64>}, {pipeline_mode = #tpu.pipeline_mode<synchronous>, transform_indices = @transform_6, window_bounds = array<i64: 1, 64>}, {pipeline_mode = #tpu.pipeline_mode<synchronous>, transform_indices = @transform_7, window_bounds = array<i64: 1, 64>}, {pipeline_mode = #tpu.pipeline_mode<synchronous>, transform_indices = @transform_8, window_bounds = array<i64: 1, 1>}, {transform_indices = @transform_9, window_bounds = array<i64: 128, 1>}]} {
    %c0 = arith.constant 0 : index
    %c0_0 = arith.constant 0 : index
    %0 = vector.load %arg1[%c0, %c0_0] : memref<128x16xbf16, #tpu.memory_space<vmem>>, vector<128x16xbf16>
    %c0_1 = arith.constant 0 : index
    %c0_2 = arith.constant 0 : index
    %1 = vector.load %arg4[%c0_1, %c0_2] : memref<16x64xbf16, #tpu.memory_space<vmem>>, vector<16x64xbf16>
    %cst = arith.constant dense<0.000000e+00> : vector<128x64xf32>
    %2 = tpu.matmul %0, %1, %cst {dimension_numbers = #tpu.dot_dimension_numbers<[1], [0], [0], [1], [0, 0, 1, 1], [], []>} : vector<128x16xbf16>, vector<16x64xbf16>, vector<128x64xf32> -> vector<128x64xf32>
    %c0_3 = arith.constant 0 : index
    %c0_4 = arith.constant 0 : index
    %3 = vector.load %arg2[%c0_3, %c0_4] : memref<128x16xbf16, #tpu.memory_space<vmem>>, vector<128x16xbf16>
    %c0_5 = arith.constant 0 : index
    %c0_6 = arith.constant 0 : index
    %4 = vector.load %arg5[%c0_5, %c0_6] : memref<16x64xbf16, #tpu.memory_space<vmem>>, vector<16x64xbf16>
    %cst_7 = arith.constant dense<0.000000e+00> : vector<128x64xf32>
    %5 = tpu.matmul %3, %4, %cst_7 {dimension_numbers = #tpu.dot_dimension_numbers<[1], [0], [0], [1], [0, 0, 1, 1], [], []>} : vector<128x16xbf16>, vector<16x64xbf16>, vector<128x64xf32> -> vector<128x64xf32>
    %6 = arith.addf %2, %5 : vector<128x64xf32>
    %c0_8 = arith.constant 0 : index
    %c0_9 = arith.constant 0 : index
    %7 = vector.load %arg3[%c0_8, %c0_9] : memref<128x32xbf16, #tpu.memory_space<vmem>>, vector<128x32xbf16>
    %c0_10 = arith.constant 0 : index
    %c0_11 = arith.constant 0 : index
    %8 = vector.load %arg6[%c0_10, %c0_11] : memref<32x64xbf16, #tpu.memory_space<vmem>>, vector<32x64xbf16>
    %cst_12 = arith.constant dense<0.000000e+00> : vector<128x64xf32>
    %9 = tpu.matmul %7, %8, %cst_12 {dimension_numbers = #tpu.dot_dimension_numbers<[1], [0], [0], [1], [0, 0, 1, 1], [], []>} : vector<128x32xbf16>, vector<32x64xbf16>, vector<128x64xf32> -> vector<128x64xf32>
    %10 = arith.addf %6, %9 : vector<128x64xf32>
    %c0_13 = arith.constant 0 : index
    %c0_14 = arith.constant 0 : index
    %11 = vector.load %arg7[%c0_13, %c0_14] : memref<1x64xf32, #tpu.memory_space<vmem>>, vector<1x64xf32>
    %12 = vector.broadcast %11 : vector<1x64xf32> to vector<128x64xf32>
    %13 = arith.addf %10, %12 : vector<128x64xf32>
    %cst_15 = arith.constant 0.000000e+00 : f32
    %14 = vector.broadcast %cst_15 : f32 to vector<128x64xf32>
    %15 = arith.maximumf %13, %14 : vector<128x64xf32>
    %c0_16 = arith.constant 0 : index
    %c0_17 = arith.constant 0 : index
    %16 = vector.load %arg8[%c0_16, %c0_17] : memref<1x64xf32, #tpu.memory_space<vmem>>, vector<1x64xf32>
    %17 = vector.broadcast %16 : vector<1x64xf32> to vector<128x64xf32>
    %18 = arith.mulf %15, %17 : vector<128x64xf32>
    %cst_18 = arith.constant dense<0.000000e+00> : vector<128xf32>
    %19 = vector.multi_reduction <add>, %18, %cst_18 [1] : vector<128x64xf32> to vector<128xf32>
    %20 = vector.shape_cast %19 : vector<128xf32> to vector<128x1xf32>
    %c0_19 = arith.constant 0 : index
    %c0_20 = arith.constant 0 : index
    %21 = vector.load %arg9[%c0_19, %c0_20] : memref<1x1xf32, #tpu.memory_space<vmem>>, vector<1x1xf32>
    %22 = vector.broadcast %21 : vector<1x1xf32> to vector<128x1xf32>
    %23 = arith.addf %20, %22 : vector<128x1xf32>
    %24 = arith.negf %23 : vector<128x1xf32>
    %25 = math.exp %24 : vector<128x1xf32>
    %cst_21 = arith.constant 1.000000e+00 : f32
    %26 = vector.broadcast %cst_21 : f32 to vector<128x1xf32>
    %27 = arith.addf %26, %25 : vector<128x1xf32>
    %28 = arith.divf %26, %27 : vector<128x1xf32>
    %c0_22 = arith.constant 0 : index
    %c0_23 = arith.constant 0 : index
    %29 = vector.load %arg10[%c0_22, %c0_23] : memref<128x1xf32, #tpu.memory_space<vmem>>, vector<128x1xf32>
    tpu.vector_store %arg10[%c0_22, %c0_23], %28 {strides = array<i32>} : memref<128x1xf32, #tpu.memory_space<vmem>>, vector<128x1xf32>,
    return
  }
  func.func @transform_0(%arg0: i32) -> (i32, i32) {
    %c0_i32 = arith.constant 0 : i32
    %c0_i32_0 = arith.constant 0 : i32
    return %arg0, %c0_i32 : i32, i32
  }
  func.func @transform_1(%arg0: i32) -> (i32, i32) {
    %c0_i32 = arith.constant 0 : i32
    %c0_i32_0 = arith.constant 0 : i32
    return %arg0, %c0_i32 : i32, i32
  }
  func.func @transform_2(%arg0: i32) -> (i32, i32) {
    %c0_i32 = arith.constant 0 : i32
    %c0_i32_0 = arith.constant 0 : i32
    return %arg0, %c0_i32 : i32, i32
  }
  func.func @transform_3(%arg0: i32) -> (i32, i32) {
    %c0_i32 = arith.constant 0 : i32
    %c0_i32_0 = arith.constant 0 : i32
    %c0_i32_1 = arith.constant 0 : i32
    return %c0_i32, %c0_i32_0 : i32, i32
  }
  func.func @transform_4(%arg0: i32) -> (i32, i32) {
    %c0_i32 = arith.constant 0 : i32
    %c0_i32_0 = arith.constant 0 : i32
    %c0_i32_1 = arith.constant 0 : i32
    return %c0_i32, %c0_i32_0 : i32, i32
  }
  func.func @transform_5(%arg0: i32) -> (i32, i32) {
    %c0_i32 = arith.constant 0 : i32
    %c0_i32_0 = arith.constant 0 : i32
    %c0_i32_1 = arith.constant 0 : i32
    return %c0_i32, %c0_i32_0 : i32, i32
  }
  func.func @transform_6(%arg0: i32) -> (i32, i32) {
    %c0_i32 = arith.constant 0 : i32
    %c0_i32_0 = arith.constant 0 : i32
    %c0_i32_1 = arith.constant 0 : i32
    return %c0_i32, %c0_i32_0 : i32, i32
  }
  func.func @transform_7(%arg0: i32) -> (i32, i32) {
    %c0_i32 = arith.constant 0 : i32
    %c0_i32_0 = arith.constant 0 : i32
    %c0_i32_1 = arith.constant 0 : i32
    return %c0_i32, %c0_i32_0 : i32, i32
  }
  func.func @transform_8(%arg0: i32) -> (i32, i32) {
    %c0_i32 = arith.constant 0 : i32
    %c0_i32_0 = arith.constant 0 : i32
    %c0_i32_1 = arith.constant 0 : i32
    return %c0_i32, %c0_i32_0 : i32, i32
  }
  func.func @transform_9(%arg0: i32) -> (i32, i32) {
    %c0_i32 = arith.constant 0 : i32
    %c0_i32_0 = arith.constant 0 : i32
    return %arg0, %c0_i32 : i32, i32
  }
}

</mosaic_0001>

<bundles_post_ra>
// kernel: tpu_custom_call.1
= control target key start
LH: loop header
LB: loop body
LE: loop exit
PB: predicated region body
PF: predicated region fallthrough
CT: control target
= control target key end

     0   :  { %vm117_vm0 = vcmask 130048   ;;  %vm478_vm1 = vcmask 261120   ;;  %vm678_vm2 = vcmask 523264   ;;  %vm846_vm3 = vcmask 7168   ;;  %s1441_s4 = inlined_call_operand.vmem [shape: bf16[16,64], index: 4, kind: input, shape index: {}]   ;;  %s1442_s1 = inlined_call_operand.vmem [shape: bf16[128,16], index: 1, kind: input, shape index: {}]   ;;  %s1443_s3 = inlined_call_operand.vmem [shape: bf16[16,64], index: 3, kind: input, shape index: {}]   ;;  %s1444_s5 = inlined_call_operand.vmem [shape: bf16[32,64], index: 5, kind: input, shape index: {}]   ;;  %s1445_s0 = inlined_call_operand.vmem [shape: bf16[128,16], index: 0, kind: input, shape index: {}]   ;;  %s1446_s2 = inlined_call_operand.vmem [shape: bf16[128,32], index: 2, kind: input, shape index: {}]   ;;  %s1447_s8 = inlined_call_operand.<no memory space> [shape: f32[1,1], index: 8, kind: input, shape index: {}]   ;;  %s1448_s6 = inlined_call_operand.vmem [shape: f32[1,64], index: 6, kind: input, shape index: {}]   ;;  %s1449_s7 = inlined_call_operand.vmem [shape: f32[1,64], index: 7, kind: input, shape index: {}]   ;;  %s1450_s9 = inlined_call_operand.vmem [shape: f32[128,1], index: 9, kind: output, shape index: {}]  }
   0x1   :  { %v1024_v0 = vld [vmem:[%s1441_s4] sm:$0xff]   ;;  %v1027_v3 = vld [vmem:[%s1442_s1 + $0x8] sm:$0xff]   ;;  %v1031_v7 = vld [vmem:[%s1442_s1 + $0x10] sm:$0xff]   ;;  %v14_v28 = vstv %s1447_s8 }
   0x2   :  { %v1025_v1 = vld [vmem:[%s1442_s1] sm:$0xff]   ;;  %966 = vmatprep.subr.bf16.mxu0 %v1024_v0  ;;  %1022 = vmatprep.subr.bf16.mxu1 %v1024_v0  ;;  %v1028_v4 = vld [vmem:[%s1442_s1 + $0x28] sm:$0xff]   ;;  %v1032_v8 = vld [vmem:[%s1442_s1 + $0x30] sm:$0xff]   ;;  %15 = vst [vmem:[#allocation2] sm:$0x1] %v14_v28 }
   0x3   :  { %v1026_v2 = vld [vmem:[%s1442_s1 + $0x20] sm:$0xff]   ;;  %967 = vmatpush3.bf16.msra.mxu0 %v1024_v0  ;;  %1023 = vmatpush3.bf16.msra.mxu1 %v1024_v0  ;;  %v1030_v6 = vld [vmem:[%s1444_s5 + $0x8] sm:$0xff]   ;;  %v1033_v9 = vld [vmem:[%s1442_s1 + $0x18] sm:$0xff]  }
   0x4   :  { %968 = vmatprep.mubr.msk.bf16.mxu0 %vm117_vm0, %v1025_v1  ;;  %976 = vmatprep.mubr.msk.bf16.mxu1 %vm117_vm0, %v1026_v2  ;;  %v1029_v5 = vld [vmem:[%s1443_s3] sm:$0xff]   ;;  %v1034_v10 = vld [vmem:[%s1442_s1 + $0x38] sm:$0xff]   ;;  %v1038_v14 = vld [vmem:[%s1445_s0 + $0x8] sm:$0xff]  }
   0x5   :  { %984 = vmatprep.subr.bf16.mxu1 %v1029_v5  ;;  %1002 = vmatprep.subr.bf16.mxu0 %v1030_v6  ;;  %v1035_v11 = vld [vmem:[%s1444_s5] sm:$0xff]   ;;  %v1039_v15 = vld [vmem:[%s1446_s2 + $0x8] sm:$0xff]   ;;  %v1040_v16 = vld [vmem:[%s1445_s0 + $0x10] sm:$0xff]  }
   0x6   :  { %969 = vmatmul.mubr.msk.bf16.vlgmr.msra.gmra.mxu0 %vm117_vm0, %v1027_v3  ;;  %977 = vmatmul.mubr.msk.bf16.vlgmr.msra.gmra.mxu1 %vm117_vm0, %v1028_v4  ;;  %v1036_v12 = vld [vmem:[%s1445_s0] sm:$0xff]   ;;  %v1041_v17 = vld [vmem:[%s1446_s2 + $0x10] sm:$0xff]   ;;  %v1042_v18 = vld [vmem:[%s1445_s0 + $0x18] sm:$0xff]  }
   0x7   :  { %985 = vmatpush3.bf16.msra.mxu1 %v1029_v5  ;;  %1003 = vmatpush3.bf16.msra.mxu0 %v1030_v6  ;;  %v1037_v13 = vld [vmem:[%s1446_s2] sm:$0xff]   ;;  %v1043_v19 = vld [vmem:[%s1446_s2 + $0x18] sm:$0xff]   ;;  %v1046_v22 = vld [vmem:[%s1445_s0 + $0x28] sm:$0xff]  }
   0x8   :  { %972 = vmatprep.mubr.msk.bf16.mxu0 %vm117_vm0, %v1031_v7  ;;  %980 = vmatprep.mubr.msk.bf16.mxu1 %vm117_vm0, %v1032_v8  ;;  %v1044_v20 = vld [vmem:[%s1445_s0 + $0x20] sm:$0xff]   ;;  %v1047_v23 = vld [vmem:[%s1446_s2 + $0x28] sm:$0xff]   ;;  %v1048_v24 = vld [vmem:[%s1445_s0 + $0x30] sm:$0xff]  }
   0x9   :  { %1004 = vmatprep.subr.bf16.mxu0 %v1035_v11  ;;  %v1045_v21 = vld [vmem:[%s1446_s2 + $0x20] sm:$0xff]   ;;  %v1049_v25 = vld [vmem:[%s1446_s2 + $0x30] sm:$0xff]   ;;  %v1050_v26 = vld [vmem:[%s1445_s0 + $0x38] sm:$0xff]  }
   0xa   :  { %v1051_v27 = vld [vmem:[%s1446_s2 + $0x38] sm:$0xff]   ;;  %v1296_v48 = vld [vmem:[%s1448_s6] ss:$0 sm:$0xff] }
   0xb   :  { %1005 = vmatpush3.bf16.msra.mxu0 %v1035_v11  ;;  %v1303_v0 = vld [vmem:[%s1449_s7] ss:$0 sm:$0xff] }
   0xe   :  { %973 = vmatmul.mubr.msk.bf16.gmra.mxu0 %vm117_vm0, %v1033_v9  ;;  %981 = vmatmul.mubr.msk.bf16.gmra.mxu1 %vm117_vm0, %v1034_v10 }
   0xf   :  { %986 = vmatprep.mubr.msk.bf16.mxu1 %vm117_vm0, %v1036_v12  ;;  %1006 = vmatprep.mubr.msk.bf16.mxu0 %vm478_vm1, %v1037_v13 }
  0x16   :  { %987 = vmatmul.mubr.msk.bf16.vlgmr.msra.gmra.mxu1 %vm117_vm0, %v1038_v14  ;;  %1007 = vmatmul.mubr.msk.bf16.vlgmr.msra.gmra.mxu0 %vm478_vm1, %v1039_v15 }
  0x17   :  { %990 = vmatprep.mubr.msk.bf16.mxu1 %vm117_vm0, %v1040_v16  ;;  %1010 = vmatprep.mubr.msk.bf16.mxu0 %vm478_vm1, %v1041_v17 }
  0x1e   :  { %991 = vmatmul.mubr.msk.bf16.gmra.mxu1 %vm117_vm0, %v1042_v18  ;;  %1011 = vmatmul.mubr.msk.bf16.gmra.mxu0 %vm478_vm1, %v1043_v19 }
  0x1f   :  { %994 = vmatprep.mubr.msk.bf16.mxu1 %vm117_vm0, %v1044_v20  ;;  %1014 = vmatprep.mubr.msk.bf16.mxu0 %vm478_vm1, %v1045_v21 }
  0x26   :  { %995 = vmatmul.mubr.msk.bf16.gmra.mxu1 %vm117_vm0, %v1046_v22  ;;  %1015 = vmatmul.mubr.msk.bf16.gmra.mxu0 %vm478_vm1, %v1047_v23 }
  0x27   :  { %998 = vmatprep.mubr.msk.bf16.mxu1 %vm117_vm0, %v1048_v24  ;;  %1018 = vmatprep.mubr.msk.bf16.mxu0 %vm478_vm1, %v1049_v25 }
  0x2e   :  { %999 = vmatmul.mubr.msk.bf16.gmra.mxu1 %vm117_vm0, %v1050_v26  ;;  %1019 = vmatmul.mubr.msk.bf16.gmra.mxu0 %vm478_vm1, %v1051_v27 }
  0xc6   :  { %v970_v29 = vpop.f32.mrf.mxu0  ;;  %v1277_v30 = vpop.f32.mrf.mxu1 }
  0xc8   :  { %v176_v31 = vpop.f32.mrf.mxu0  ;;  %v1279_v32 = vpop.f32.mrf.mxu1 }
  0xca   :  { %v971_v33 = vpop.f32.mrf.mxu0  ;;  %v1281_v34 = vpop.f32.mrf.mxu1 }
  0xcc   :  { %v179_v35 = vpop.f32.mrf.mxu0  ;;  %v1283_v36 = vpop.f32.mrf.mxu1 }
  0xce   :  { %v974_v37 = vpop.f32.mrf.mxu0  ;;  %v1285_v38 = vpop.f32.mrf.mxu1 }
  0xd0   :  { %v192_v39 = vpop.f32.mrf.mxu0  ;;  %v1287_v40 = vpop.f32.mrf.mxu1 }
  0xd2   :  { %v975_v41 = vpop.f32.mrf.mxu0  ;;  %v1289_v42 = vpop.f32.mrf.mxu1 }
  0xd4   :  { %v195_v43 = vpop.f32.mrf.mxu0  ;;  %v1291_v44 = vpop.f32.mrf.mxu1 }
  0xd6   :  { %v988_v45 = vpop.f32.mrf.mxu1  ;;  %v1008_v46 = vpop.f32.mrf.mxu0 }
  0xd7   :  { %v352_v47 = vadd.f32 %v988_v45, %v970_v29 }
  0xd8   :  { %v343_v49 = vpop.f32.mrf.mxu1  ;;  %v537_v50 = vpop.f32.mrf.mxu0 }
  0xd9   :  { %v602_v51 = vadd.f32 %v1008_v46, %v352_v47  ;;  %v344_v52 = vadd.f32 %v343_v49, %v176_v31 }
  0xda   :  { %v989_v53 = vpop.f32.mrf.mxu1  ;;  %v1009_v54 = vpop.f32.mrf.mxu0 }
  0xdb   :  { %v625_v55 = vadd.f32 %v1296_v48, %v602_v51  ;;  %v600_v56 = vadd.f32 %v537_v50, %v344_v52  ;;  %v355_v57 = vadd.f32 %v989_v53, %v971_v33 }
  0xdc   :  { %v346_v58 = vpop.f32.mrf.mxu1  ;;  %v540_v59 = vpop.f32.mrf.mxu0 }
  0xdd   :  { %v641_v60 = vmax.f32 %v625_v55, 0.0  ;;  %v623_v61 = vadd.f32 %v1296_v48, %v600_v56  ;;  %v603_v62 = vadd.f32 %v1009_v54, %v355_v57  ;;  %v347_v63 = vadd.f32 %v346_v58, %v179_v35 }
  0xde   :  { %v992_v1 = vpop.f32.mrf.mxu1  ;;  %v1012_v2 = vpop.f32.mrf.mxu0 }
  0xdf   :  { %v639_v3 = vmax.f32 %v623_v61, 0.0  ;;  %v626_v4 = vadd.f32 %v1296_v48, %v603_v62  ;;  %v601_v5 = vadd.f32 %v540_v59, %v347_v63  ;;  %v368_v6 = vadd.f32 %v992_v1, %v974_v37 }
  0xe0   :  { %v359_v7 = vpop.f32.mrf.mxu1  ;;  %v553_v8 = vpop.f32.mrf.mxu0  ;;  %v664_v9 = vmul.f32 %v1303_v0, %v641_v60 }
  0xe1   :  { %v642_v10 = vmax.f32 %v626_v4, 0.0  ;;  %v624_v11 = vadd.f32 %v1296_v48, %v601_v5  ;;  %v606_v12 = vadd.f32 %v1012_v2, %v368_v6  ;;  %v360_v13 = vadd.f32 %v359_v7, %v192_v39 }
  0xe2   :  { %v1013_v14 = vpop.f32.mrf.mxu0  ;;  %v685_v15 = vsel %vm678_vm2, %v664_v9, 0.0  ;;  %v993_v16 = vpop.f32.mrf.mxu1  ;;  %v662_v17 = vmul.f32 %v1303_v0, %v639_v3 }
  0xe3   :  { %v640_v18 = vmax.f32 %v624_v11, 0.0  ;;  %v629_v19 = vadd.f32 %v1296_v48, %v606_v12  ;;  %v604_v20 = vadd.f32 %v553_v8, %v360_v13  ;;  %686 = vadd.xlane.f32.xlu1 %v685_v15  ;;  %v371_v21 = vadd.f32 %v993_v16, %v975_v41 }
  0xe4   :  { %v362_v22 = vpop.f32.mrf.mxu1  ;;  %v556_v23 = vpop.f32.mrf.mxu0  ;;  %v679_v24 = vsel %vm678_vm2, %v662_v17, 0.0  ;;  %v665_v25 = vmul.f32 %v1303_v0, %v642_v10 }
  0xe5   :  { %v645_v26 = vmax.f32 %v629_v19, 0.0  ;;  %v627_v27 = vadd.f32 %v1296_v48, %v604_v20  ;;  %v607_v28 = vadd.f32 %v1013_v14, %v371_v21  ;;  %v363_v29 = vadd.f32 %v362_v22, %v195_v43  ;;  %680 = vadd.xlane.f32.xlu0 %v679_v24 }
  0xe6   :  { %v1016_v31 = vpop.f32.mrf.mxu0  ;;  %v688_v33 = vsel %vm678_vm2, %v665_v25, 0.0  ;;  %v996_v35 = vpop.f32.mrf.mxu1  ;;  %v663_v37 = vmul.f32 %v1303_v0, %v640_v18 }
  0xe7   :  { %v630_v39 = vadd.f32 %v1296_v48, %v607_v28  ;;  %v605_v41 = vadd.f32 %v556_v23, %v363_v29  ;;  %689 = vadd.xlane.f32.xlu1 %v688_v33  ;;  %v384_v45 = vadd.f32 %v996_v35, %v1277_v30  ;;  %v643_v46 = vmax.f32 %v627_v27, 0.0 }
  0xe8   :  { %v375_v47 = vpop.f32.mrf.mxu1  ;;  %v569_v49 = vpop.f32.mrf.mxu0  ;;  %v682_v50 = vsel %vm678_vm2, %v663_v37, 0.0  ;;  %v668_v43 = vmul.f32 %v1303_v0, %v645_v26 }
  0xe9   :  { %v628_v51 = vadd.f32 %v1296_v48, %v605_v41  ;;  %v610_v52 = vadd.f32 %v1016_v31, %v384_v45  ;;  %v376_v53 = vadd.f32 %v375_v47, %v1279_v32  ;;  %683 = vadd.xlane.f32.xlu0 %v682_v50  ;;  %v646_v54 = vmax.f32 %v630_v39, 0.0 }
  0xea   :  { %v997_v55 = vpop.f32.mrf.mxu1  ;;  %v1017_v56 = vpop.f32.mrf.mxu0  ;;  %v697_v62 = vsel %vm678_vm2, %v668_v43, 0.0  ;;  %v666_v1 = vmul.f32 %v1303_v0, %v643_v46 }
  0xeb   :  { %v644_v57 = vmax.f32 %v628_v51, 0.0  ;;  %v633_v58 = vadd.f32 %v1296_v48, %v610_v52  ;;  %v608_v30 = vadd.f32 %v569_v49, %v376_v53  ;;  %v387_v59 = vadd.f32 %v997_v55, %v1281_v34 }
  0xec   :  { %v378_v60 = vpop.f32.mrf.mxu1  ;;  %v572_v61 = vpop.f32.mrf.mxu0  ;;  %v669_v63 = vmul.f32 %v1303_v0, %v646_v54  ;;  %v691_v14 = vsel %vm678_vm2, %v666_v1, 0.0 }
  0xed   :  { %v631_v32 = vadd.f32 %v1296_v48, %v608_v30  ;;  %v611_v2 = vadd.f32 %v1017_v56, %v387_v59  ;;  %v379_v3 = vadd.f32 %v378_v60, %v1283_v36  ;;  %698 = vadd.xlane.f32.xlu0 %v697_v62  ;;  %v667_v34 = vmul.f32 %v1303_v0, %v644_v57  ;;  %v1359_v57 = vld [vmem:[#allocation2] ss:$0 sm:$0xff] }
  0xee   :  { %v1020_v4 = vpop.f32.mrf.mxu0  ;;  %v700_v5 = vsel %vm678_vm2, %v669_v63, 0.0  ;;  %v1000_v6 = vpop.f32.mrf.mxu1  ;;  %v649_v7 = vmax.f32 %v633_v58, 0.0 }
  0xef   :  { %v634_v8 = vadd.f32 %v1296_v48, %v611_v2  ;;  %v609_v9 = vadd.f32 %v572_v61, %v379_v3  ;;  %701 = vadd.xlane.f32.xlu1 %v700_v5  ;;  %v400_v10 = vadd.f32 %v1000_v6, %v1285_v38  ;;  %v647_v11 = vmax.f32 %v631_v32, 0.0 }
  0xf0   :  { %v391_v12 = vpop.f32.mrf.mxu1  ;;  %v585_v13 = vpop.f32.mrf.mxu0  ;;  %v672_v36 = vmul.f32 %v1303_v0, %v649_v7  ;;  %v694_v21 = vsel %vm678_vm2, %v667_v34, 0.0 }
  0xf1   :  { %v650_v15 = vmax.f32 %v634_v8, 0.0  ;;  %v632_v16 = vadd.f32 %v1296_v48, %v609_v9  ;;  %v614_v17 = vadd.f32 %v1020_v4, %v400_v10  ;;  %v392_v18 = vadd.f32 %v391_v12, %v1287_v40  ;;  %692 = vadd.xlane.f32.xlu0 %v691_v14 }
  0xf2   :  { %v1001_v19 = vpop.f32.mrf.mxu1  ;;  %v1021_v20 = vpop.f32.mrf.mxu0  ;;  %v709_v26 = vsel %vm678_vm2, %v672_v36, 0.0  ;;  %v670_v28 = vmul.f32 %v1303_v0, %v647_v11 }
  0xf3   :  { %v648_v22 = vmax.f32 %v632_v16, 0.0  ;;  %v612_v38 = vadd.f32 %v585_v13, %v392_v18  ;;  %v403_v23 = vadd.f32 %v1001_v19, %v1289_v42  ;;  %695 = vadd.xlane.f32.xlu1 %v694_v21  ;;  %v637_v24 = vadd.f32 %v1296_v48, %v614_v17 }
  0xf4   :  { %v394_v25 = vpop.f32.mrf.mxu1  ;;  %v673_v27 = vmul.f32 %v1303_v0, %v650_v15  ;;  %v588_v33 = vpop.f32.mrf.mxu0  ;;  %v703_v45 = vsel %vm678_vm2, %v670_v28, 0.0 }
  0xf5   :  { %v635_v40 = vadd.f32 %v1296_v48, %v612_v38  ;;  %v615_v29 = vadd.f32 %v1021_v20, %v403_v23  ;;  %v395_v31 = vadd.f32 %v394_v25, %v1291_v44  ;;  %710 = vadd.xlane.f32.xlu0 %v709_v26  ;;  %v671_v42 = vmul.f32 %v1303_v0, %v648_v22 }
  0xf6   :  { %v712_v35 = vsel %vm678_vm2, %v673_v27, 0.0  ;;  %v653_v46 = vmax.f32 %v637_v24, 0.0 }
  0xf7   :  { %v651_v37 = vmax.f32 %v635_v40, 0.0  ;;  %v638_v39 = vadd.f32 %v1296_v48, %v615_v29  ;;  %v613_v41 = vadd.f32 %v588_v33, %v395_v31  ;;  %713 = vadd.xlane.f32.xlu1 %v712_v35  ;;  %v706_v44 = vsel %vm678_vm2, %v671_v42, 0.0 }
  0xf8   :  { %v676_v52 = vmul.f32 %v1303_v0, %v653_v46 }
  0xf9   :  { %v636_v47 = vadd.f32 %v1296_v48, %v613_v41  ;;  %704 = vadd.xlane.f32.xlu0 %v703_v45  ;;  %v674_v49 = vmul.f32 %v1303_v0, %v651_v37  ;;  %v654_v50 = vmax.f32 %v638_v39, 0.0 }
  0xfa   :  { %v721_v48 = vsel %vm678_vm2, %v676_v52, 0.0 }
  0xfb   :  { %v652_v43 = vmax.f32 %v636_v47, 0.0  ;;  %707 = vadd.xlane.f32.xlu1 %v706_v44  ;;  %v715_v51 = vsel %vm678_vm2, %v674_v49, 0.0  ;;  %v677_v55 = vmul.f32 %v1303_v0, %v654_v50 }
  0xfd   :  { %716 = vadd.xlane.f32.xlu0 %v715_v51  ;;  %v675_v53 = vmul.f32 %v1303_v0, %v652_v43  ;;  %v724_v56 = vsel %vm678_vm2, %v677_v55, 0.0 }
  0xff   :  { %v718_v54 = vsel %vm678_vm2, %v675_v53, 0.0 }
 0x100   :  { %719 = vadd.xlane.f32.xlu1 %v718_v54 }
 0x101   :  { %722 = vadd.xlane.f32.xlu0 %v721_v48 }
 0x104   :  { %725 = vadd.xlane.f32.xlu1 %v724_v56 }
 0x16c   :  { %v687_v58 = vpop.xlane.xlu1 %686 }
 0x16d   :  { %v736_v30 = vadd.f32 %v1359_v57, %v687_v58 }
 0x16e   :  { %v681_v59 = vpop.xlane.xlu0 %680 }
 0x16f   :  { %v924_v60 = vmul.f32 -1.442695, %v736_v30  ;;  %v734_v61 = vadd.f32 %v1359_v57, %v681_v59 }
 0x170   :  { %v690_v62 = vpop.xlane.xlu1 %689 }
 0x171   :  { %1052 = vpow2.f32 %v924_v60  ;;  %v922_v63 = vmul.f32 -1.442695, %v734_v61  ;;  %v737_v0 = vadd.f32 %v1359_v57, %v690_v62 }
 0x172   :  { %v684_v1 = vpop.xlane.xlu0 %683 }
 0x173   :  { %1054 = vpow2.f32 %v922_v63  ;;  %v925_v32 = vmul.f32 -1.442695, %v737_v0  ;;  %v735_v2 = vadd.f32 %v1359_v57, %v684_v1 }
 0x175   :  { %1056 = vpow2.f32 %v925_v32  ;;  %v923_v3 = vmul.f32 -1.442695, %v735_v2 }
 0x176   :  { %v699_v4 = vpop.xlane.xlu0 %698 }
 0x177   :  { %1058 = vpow2.f32 %v923_v3  ;;  %v740_v5 = vadd.f32 %v1359_v57, %v699_v4 }
 0x178   :  { %v702_v6 = vpop.xlane.xlu1 %701 }
 0x179   :  { %v928_v34 = vmul.f32 -1.442695, %v740_v5  ;;  %v741_v7 = vadd.f32 %v1359_v57, %v702_v6 }
 0x17a   :  { %v693_v8 = vpop.xlane.xlu0 %692 }
 0x17b   :  { %1060 = vpow2.f32 %v928_v34  ;;  %v929_v9 = vmul.f32 -1.442695, %v741_v7  ;;  %v738_v10 = vadd.f32 %v1359_v57, %v693_v8 }
 0x17c   :  { %v696_v11 = vpop.xlane.xlu1 %695 }
 0x17d   :  { %1062 = vpow2.f32 %v929_v9  ;;  %v926_v12 = vmul.f32 -1.442695, %v738_v10  ;;  %v739_v13 = vadd.f32 %v1359_v57, %v696_v11 }
 0x17e   :  { %v1053_v14 = vpop.eup %1052  ;;  %v711_v36 = vpop.xlane.xlu0 %710 }
 0x17f   :  { %v800_v15 = vadd.f32 1.0, %v1053_v14  ;;  %1064 = vpow2.f32 %v926_v12  ;;  %v927_v16 = vmul.f32 -1.442695, %v739_v13  ;;  %v744_v17 = vadd.f32 %v1359_v57, %v711_v36 }
 0x180   :  { %v1055_v18 = vpop.eup %1054  ;;  %v714_v19 = vpop.xlane.xlu1 %713 }
 0x181   :  { %1066 = vrcp.f32 %v800_v15  ;;  %v798_v20 = vadd.f32 1.0, %v1055_v18  ;;  %v932_v21 = vmul.f32 -1.442695, %v744_v17  ;;  %v745_v22 = vadd.f32 %v1359_v57, %v714_v19 }
 0x182   :  { %v1057_v38 = vpop.eup %1056  ;;  %1068 = vpow2.f32 %v927_v16  ;;  %v705_v23 = vpop.xlane.xlu0 %704 }
 0x183   :  { %1070 = vrcp.f32 %v798_v20  ;;  %v801_v24 = vadd.f32 1.0, %v1057_v38  ;;  %v933_v25 = vmul.f32 -1.442695, %v745_v22  ;;  %v742_v26 = vadd.f32 %v1359_v57, %v705_v23 }
 0x184   :  { %v1059_v27 = vpop.eup %1058  ;;  %1072 = vpow2.f32 %v932_v21  ;;  %v708_v28 = vpop.xlane.xlu1 %707 }
 0x185   :  { %1074 = vrcp.f32 %v801_v24  ;;  %v799_v40 = vadd.f32 1.0, %v1059_v27  ;;  %v930_v29 = vmul.f32 -1.442695, %v742_v26  ;;  %v743_v31 = vadd.f32 %v1359_v57, %v708_v28 }
 0x186   :  { %1076 = vpow2.f32 %v933_v25  ;;  %v717_v33 = vpop.xlane.xlu0 %716 }
 0x187   :  { %1078 = vrcp.f32 %v799_v40  ;;  %v931_v35 = vmul.f32 -1.442695, %v743_v31  ;;  %v746_v42 = vadd.f32 %v1359_v57, %v717_v33 }
 0x188   :  { %v1061_v37 = vpop.eup %1060  ;;  %1080 = vpow2.f32 %v930_v29 }
 0x189   :  { %v804_v39 = vadd.f32 1.0, %v1061_v37  ;;  %1082 = vpow2.f32 %v931_v35  ;;  %v934_v41 = vmul.f32 -1.442695, %v746_v42  ;;  %v720_v45 = vpop.xlane.xlu1 %719 }
 0x18a   :  { %v1063_v46 = vpop.eup %1062  ;;  %v747_v47 = vadd.f32 %v1359_v57, %v720_v45  ;;  %v723_v49 = vpop.xlane.xlu0 %722 }
 0x18b   :  { %1084 = vrcp.f32 %v804_v39  ;;  %v805_v44 = vadd.f32 1.0, %v1063_v46  ;;  %v748_v50 = vadd.f32 %v1359_v57, %v723_v49 }
 0x18c   :  { %v1065_v43 = vpop.eup %1064  ;;  %1086 = vpow2.f32 %v934_v41  ;;  %v935_v51 = vmul.f32 -1.442695, %v747_v47 }
 0x18d   :  { %1088 = vrcp.f32 %v805_v44  ;;  %v802_v52 = vadd.f32 1.0, %v1065_v43  ;;  %v936_v53 = vmul.f32 -1.442695, %v748_v50  ;;  %v726_v54 = vpop.xlane.xlu1 %725 }
 0x18e   :  { %v1067_v55 = vpop.eup %1066  ;;  %1090 = vpow2.f32 %v935_v51  ;;  %v749_v48 = vadd.f32 %v1359_v57, %v726_v54 }
 0x18f   :  { %v1069_v56 = vpop.eup %1068  ;;  %849 = vst.msk [vmem:[%s1450_s9 + $0x10] sm:$0xff] %vm846_vm3, %v1067_v55  ;;  %1092 = vrcp.f32 %v802_v52 }
 0x190   :  { %v1071_v58 = vpop.eup %1070  ;;  %v803_v30 = vadd.f32 1.0, %v1069_v56  ;;  %1094 = vpow2.f32 %v936_v53  ;;  %v937_v59 = vmul.f32 -1.442695, %v749_v48 }
 0x191   :  { %v1073_v60 = vpop.eup %1072  ;;  %847 = vst.msk [vmem:[%s1450_s9] sm:$0xff] %vm846_vm3, %v1071_v58 }
 0x192   :  { %v1075_v61 = vpop.eup %1074  ;;  %1096 = vrcp.f32 %v803_v30  ;;  %v808_v57 = vadd.f32 1.0, %v1073_v60 }
 0x193   :  { %v1077_v62 = vpop.eup %1076  ;;  %850 = vst.msk [vmem:[%s1450_s9 + $0x18] sm:$0xff] %vm846_vm3, %v1075_v61  ;;  %1098 = vpow2.f32 %v937_v59 }
 0x194   :  { %v1079_v63 = vpop.eup %1078  ;;  %1100 = vrcp.f32 %v808_v57  ;;  %v809_v0 = vadd.f32 1.0, %v1077_v62 }
 0x195   :  { %v1081_v1 = vpop.eup %1080  ;;  %848 = vst.msk [vmem:[%s1450_s9 + $0x8] sm:$0xff] %vm846_vm3, %v1079_v63 }
 0x196   :  { %v1083_v32 = vpop.eup %1082  ;;  %1102 = vrcp.f32 %v809_v0  ;;  %v806_v2 = vadd.f32 1.0, %v1081_v1 }
 0x197   :  { %v807_v3 = vadd.f32 1.0, %v1083_v32 }
 0x198   :  { %v1085_v4 = vpop.eup %1084  ;;  %1104 = vrcp.f32 %v806_v2 }
 0x199   :  { %v1087_v5 = vpop.eup %1086  ;;  %853 = vst.msk [vmem:[%s1450_s9 + $0x30] sm:$0xff] %vm846_vm3, %v1085_v4  ;;  %1106 = vrcp.f32 %v807_v3 }
 0x19a   :  { %v1089_v6 = vpop.eup %1088  ;;  %v810_v34 = vadd.f32 1.0, %v1087_v5 }
 0x19b   :  { %v1091_v7 = vpop.eup %1090  ;;  %854 = vst.msk [vmem:[%s1450_s9 + $0x38] sm:$0xff] %vm846_vm3, %v1089_v6 }
 0x19c   :  { %v1093_v8 = vpop.eup %1092  ;;  %1108 = vrcp.f32 %v810_v34  ;;  %v811_v9 = vadd.f32 1.0, %v1091_v7 }
 0x19d   :  { %v1095_v10 = vpop.eup %1094  ;;  %851 = vst.msk [vmem:[%s1450_s9 + $0x20] sm:$0xff] %vm846_vm3, %v1093_v8 }
 0x19e   :  { %1110 = vrcp.f32 %v811_v9  ;;  %v812_v11 = vadd.f32 1.0, %v1095_v10 }
 0x19f   :  { %v1097_v12 = vpop.eup %1096 }
 0x1a0   :  { %v1099_v13 = vpop.eup %1098  ;;  %852 = vst.msk [vmem:[%s1450_s9 + $0x28] sm:$0xff] %vm846_vm3, %v1097_v12  ;;  %1112 = vrcp.f32 %v812_v11 }
 0x1a1   :  { %v1101_v14 = vpop.eup %1100  ;;  %v813_v36 = vadd.f32 1.0, %v1099_v13 }
 0x1a2   :  { %857 = vst.msk [vmem:[%s1450_s9 + $0x50] sm:$0xff] %vm846_vm3, %v1101_v14 }
 0x1a3   :  { %v1103_v15 = vpop.eup %1102  ;;  %1114 = vrcp.f32 %v813_v36 }
 0x1a4   :  { %858 = vst.msk [vmem:[%s1450_s9 + $0x58] sm:$0xff] %vm846_vm3, %v1103_v15 }
 0x1a5   :  { %v1105_v16 = vpop.eup %1104 }
 0x1a6   :  { %v1107_v17 = vpop.eup %1106  ;;  %855 = vst.msk [vmem:[%s1450_s9 + $0x40] sm:$0xff] %vm846_vm3, %v1105_v16 }
 0x1a7   :  { %856 = vst.msk [vmem:[%s1450_s9 + $0x48] sm:$0xff] %vm846_vm3, %v1107_v17 }
 0x1a9   :  { %v1109_v18 = vpop.eup %1108 }
 0x1aa   :  { %859 = vst.msk [vmem:[%s1450_s9 + $0x60] sm:$0xff] %vm846_vm3, %v1109_v18 }
 0x1ab   :  { %v1111_v19 = vpop.eup %1110 }
 0x1ac   :  { %860 = vst.msk [vmem:[%s1450_s9 + $0x68] sm:$0xff] %vm846_vm3, %v1111_v19 }
 0x1ad   :  { %v1113_v20 = vpop.eup %1112 }
 0x1ae   :  { %861 = vst.msk [vmem:[%s1450_s9 + $0x70] sm:$0xff] %vm846_vm3, %v1113_v20 }
 0x1b0   :  { %v1115_v21 = vpop.eup %1114 }
 0x1b1   :  { %862 = vst.msk [vmem:[%s1450_s9 + $0x78] sm:$0xff] %vm846_vm3, %v1115_v21 }

</bundles_post_ra>
